<compile_context>
chip_gen: v5e
topology: v5e:2x2
jax: 0.10.0
libtpu: 0.0.40
codegen_flags: <defaults>
</compile_context>

<pallas_src>
import jax
import jax.numpy as jnp
from jax.experimental import pallas as pl
from jax.experimental.pallas import tpu as pltpu

_LANE = 128


def _round_down(x, m):
    return (x // m) * m


def _make_capsule_loss_kernel(B, D, bb, dd, mask_rows, mask_cols, inv_batch):
    def kernel(labels_ref, classes_ref, img_ref, rec_ref, out_ref, acc_ref):
        i = pl.program_id(0)                      # batch-row tile
        j = pl.program_id(1)                      # feature-column tile

        @pl.when((i == 0) & (j == 0))
        def _init():
            acc_ref[...] = jnp.zeros_like(acc_ref)

        # Hot path: squared difference in f32, reduced per tile (VALU vreg tree
        # + one small cross-lane reduce) into a (1,1) scalar accumulator.
        diff = rec_ref[...].astype(jnp.float32) - img_ref[...].astype(jnp.float32)
        if mask_rows or mask_cols:                # trace-time: emitted only if ragged
            valid = None
            if mask_rows:
                row = jax.lax.broadcasted_iota(jnp.int32, (bb, dd), 0) + i * bb
                valid = row < B
            if mask_cols:
                col = jax.lax.broadcasted_iota(jnp.int32, (bb, dd), 1) + j * dd
                vc = col < D
                valid = vc if valid is None else (valid & vc)
            diff = jnp.where(valid, diff, 0.0)
        acc_ref[...] += jnp.sum(diff * diff)

        @pl.when((i == pl.num_programs(0) - 1) & (j == pl.num_programs(1) - 1))
        def _finalize():
            # Margin term: tiny [B, K] compute, done once at the very end.
            classes = classes_ref[...].astype(jnp.float32)
            labels = labels_ref[...].astype(jnp.float32)
            left = jnp.maximum(0.9 - classes, 0.0)
            right = jnp.maximum(classes - 0.1, 0.0)
            margin = labels * left * left + 0.5 * (1.0 - labels) * right * right
            # Divide-by-batch as a multiply by precomputed 1/B.
            out_ref[...] = (jnp.sum(margin) + 0.0005 * acc_ref[...]) * inv_batch

    return kernel


def capsule_loss(images, labels, classes, reconstructions,
                 *, target_block_bytes=4 * 1024 * 1024):
    """images: [B,C,H,W]; labels, classes: [B,K]; reconstructions: [B, C*H*W]."""
    B, D = reconstructions.shape
    assert images.size == reconstructions.size
    img2d = images.reshape(B, D)        # free row-major view; NOT a copy
    rec2d = reconstructions

    it_img = jnp.dtype(img2d.dtype).itemsize
    it_rec = jnp.dtype(rec2d.dtype).itemsize
    itemsize = max(it_img, it_rec)
    sub = max(8, 32 // min(it_img, it_rec))   # sublane multiple: f32:8 bf16:16 8-bit:32

    # Choose block (bb, dd).  Prefer full-width rows (contiguous DMA, no column
    # masking); tile the feature axis only if `sub` full rows blow the budget.
    if D * itemsize * min(B, sub) <= target_block_bytes:
        dd = D
        rows_budget = max(1, target_block_bytes // (D * itemsize))
        if B <= sub or rows_budget >= B:
            bb = B
        else:
            bb = _round_down(min(rows_budget, B), sub)
    else:
        bb = B if B < sub else sub
        dd = max(_LANE, _round_down(target_block_bytes // (bb * itemsize), _LANE))
        if dd >= D:
            dd = D

    grid_b = pl.cdiv(B, bb)
    grid_d = pl.cdiv(D, dd)
    mask_rows = (B % bb) != 0
    mask_cols = (D % dd) != 0

    cost = pl.CostEstimate(
        flops=3 * B * D + 6 * int(labels.size),
        transcendentals=0,
        bytes_accessed=int(B * D * (it_img + it_rec)
                           + labels.size * jnp.dtype(labels.dtype).itemsize
                           + classes.size * jnp.dtype(classes.dtype).itemsize + 4))

    out = pl.pallas_call(
        _make_capsule_loss_kernel(B, D, bb, dd, mask_rows, mask_cols, 1.0 / B),
        out_shape=jax.ShapeDtypeStruct((1, 1), jnp.float32),
        grid_spec=pltpu.PrefetchScalarGridSpec(
            num_scalar_prefetch=0,
            grid=(grid_b, grid_d),
            in_specs=[
                # Tiny [B, K] operands: full-array blocks, fetched once.
                pl.BlockSpec(labels.shape, lambda i, j: (0, 0)),
                pl.BlockSpec(classes.shape, lambda i, j: (0, 0)),
                # Large operands: tiled over (batch rows, feature cols),
                # auto double-buffered by the BlockSpec pipeline.
                pl.BlockSpec((bb, dd), lambda i, j: (i, j)),
                pl.BlockSpec((bb, dd), lambda i, j: (i, j)),
            ],
            out_specs=pl.BlockSpec((1, 1), lambda i, j: (0, 0)),
            scratch_shapes=[pltpu.VMEM((1, 1), jnp.float32)],
        ),
        compiler_params=pltpu.CompilerParams(
            dimension_semantics=("arbitrary", "arbitrary"),
            vmem_limit_bytes=48 * 1024 * 1024,
        ),
        cost_estimate=cost,
    )(labels, classes, img2d, rec2d)

    return out[0, 0]


def capsule_loss_ref(images, labels, classes, reconstructions):
    """Pure-JAX reference mirroring the PyTorch forward."""
    B = reconstructions.shape[0]
    left = jnp.maximum(0.9 - classes, 0.0) ** 2
    right = jnp.maximum(classes - 0.1, 0.0) ** 2
    margin_loss = jnp.sum(labels * left + 0.5 * (1.0 - labels) * right)
    img = images.reshape(B, -1)
    rec_loss = jnp.sum((reconstructions - img) ** 2)
    return (margin_loss + 0.0005 * rec_loss) / B


def _run_case(key, B, C, H, W, K, **kw):
    k1, k2, k3, k4 = jax.random.split(key, 4)
    images = jax.random.uniform(k1, (B, C, H, W), dtype=jnp.float32)
    lab_idx = jax.random.randint(k2, (B,), 0, K)
    labels = jax.nn.one_hot(lab_idx, K, dtype=jnp.float32)
    classes = jax.random.uniform(k3, (B, K), dtype=jnp.float32)
    reconstructions = jax.random.uniform(k4, (B, C * H * W), dtype=jnp.float32)

    out = capsule_loss(images, labels, classes, reconstructions, **kw)
    out = jax.block_until_ready(out)
    ref = capsule_loss_ref(images, labels, classes, reconstructions)
    assert jnp.allclose(out, ref, rtol=1e-5, atol=1e-5), (out, ref)


if __name__ == "__main__":
    key = jax.random.PRNGKey(0)
    k_a, k_b, k_c, k_d = jax.random.split(key, 4)

    # Primary small case (matches the module's implied shapes): single block.
    _run_case(k_a, B=2, C=4, H=16, W=16, K=10)
    # Ragged feature dim (D=588, not a multiple of 128): full-dim block, no copy.
    _run_case(k_b, B=3, C=3, H=14, W=14, K=10)
    # Multi-step row tiling with a ragged last row block (B=13, bb=8).
    _run_case(k_c, B=13, C=1, H=16, W=16, K=10, target_block_bytes=8192)
    # Column tiling with a ragged last column block (D=1000, dd=512).
    _run_case(k_d, B=2, C=1, H=25, W=40, K=10, target_block_bytes=4096)

    print("KERNEL_OK")
</pallas_src>

<mosaic_0001>
module attributes {stable_mosaic.version = 11 : i64} {
  func.func @kernel(%arg0: i32, %arg1: i32, %arg2: memref<2x10xf32, #tpu.memory_space<vmem>>, %arg3: memref<2x10xf32, #tpu.memory_space<vmem>>, %arg4: memref<2x1024xf32, #tpu.memory_space<vmem>>, %arg5: memref<2x1024xf32, #tpu.memory_space<vmem>>, %arg6: memref<1x1xf32, #tpu.memory_space<vmem>>, %arg7: memref<1x1xf32, #tpu.memory_space<vmem>>) attributes {dimension_semantics = [#tpu.dimension_semantics<arbitrary>, #tpu.dimension_semantics<arbitrary>], iteration_bounds = array<i64: 1, 1>, scalar_prefetch = 0 : i64, scratch_operands = 1 : i64, tpu.core_type = #tpu.core_type<tc>, window_params = [{pipeline_mode = #tpu.pipeline_mode<synchronous>, transform_indices = @transform_0, window_bounds = array<i64: 2, 10>}, {pipeline_mode = #tpu.pipeline_mode<synchronous>, transform_indices = @transform_1, window_bounds = array<i64: 2, 10>}, {transform_indices = @transform_2, window_bounds = array<i64: 2, 1024>}, {transform_indices = @transform_3, window_bounds = array<i64: 2, 1024>}, {pipeline_mode = #tpu.pipeline_mode<synchronous>, transform_indices = @transform_4, window_bounds = array<i64: 1, 1>}]} {
    %c0_i32 = arith.constant 0 : i32
    %0 = arith.cmpi eq, %arg0, %c0_i32 : i32
    %c0_i32_0 = arith.constant 0 : i32
    %1 = arith.cmpi eq, %arg1, %c0_i32_0 : i32
    %2 = arith.andi %0, %1 : i1
    %3 = arith.extui %2 : i1 to i32
    %c0_i32_1 = arith.constant 0 : i32
    %4 = arith.cmpi ne, %3, %c0_i32_1 : i32
    scf.if %4 {
      %cst_12 = arith.constant 0.000000e+00 : f32
      %22 = vector.broadcast %cst_12 : f32 to vector<1x1xf32>
      %c0_13 = arith.constant 0 : index
      %c0_14 = arith.constant 0 : index
      %23 = vector.load %arg7[%c0_13, %c0_14] : memref<1x1xf32, #tpu.memory_space<vmem>>, vector<1x1xf32>
      tpu.vector_store %arg7[%c0_13, %c0_14], %22 {strides = array<i32>} : memref<1x1xf32, #tpu.memory_space<vmem>>, vector<1x1xf32>,
    } else {
    }
    %c0 = arith.constant 0 : index
    %c0_2 = arith.constant 0 : index
    %5 = vector.load %arg5[%c0, %c0_2] : memref<2x1024xf32, #tpu.memory_space<vmem>>, vector<2x1024xf32>
    %c0_3 = arith.constant 0 : index
    %c0_4 = arith.constant 0 : index
    %6 = vector.load %arg4[%c0_3, %c0_4] : memref<2x1024xf32, #tpu.memory_space<vmem>>, vector<2x1024xf32>
    %7 = arith.subf %5, %6 : vector<2x1024xf32>
    %c0_5 = arith.constant 0 : index
    %c0_6 = arith.constant 0 : index
    %8 = vector.load %arg7[%c0_5, %c0_6] : memref<1x1xf32, #tpu.memory_space<vmem>>, vector<1x1xf32>
    %9 = arith.mulf %7, %7 : vector<2x1024xf32>
    %10 = vector.shape_cast %9 : vector<2x1024xf32> to vector<1x2x1024xf32>
    %cst = arith.constant dense<0.000000e+00> : vector<1xf32>
    %11 = vector.multi_reduction <add>, %10, %cst [1, 2] : vector<1x2x1024xf32> to vector<1xf32>
    %12 = vector.shape_cast %11 : vector<1xf32> to vector<1x1x1xf32>
    %13 = vector.extract %12[0, 0, 0] : f32 from vector<1x1x1xf32>
    %14 = vector.broadcast %13 : f32 to vector<1x1xf32>
    %15 = arith.addf %8, %14 : vector<1x1xf32>
    %c0_7 = arith.constant 0 : index
    %c0_8 = arith.constant 0 : index
    %16 = vector.load %arg7[%c0_7, %c0_8] : memref<1x1xf32, #tpu.memory_space<vmem>>, vector<1x1xf32>
    tpu.vector_store %arg7[%c0_7, %c0_8], %15 {strides = array<i32>} : memref<1x1xf32, #tpu.memory_space<vmem>>, vector<1x1xf32>,
    %c0_i32_9 = arith.constant 0 : i32
    %17 = arith.cmpi eq, %arg0, %c0_i32_9 : i32
    %c0_i32_10 = arith.constant 0 : i32
    %18 = arith.cmpi eq, %arg1, %c0_i32_10 : i32
    %19 = arith.andi %17, %18 : i1
    %20 = arith.extui %19 : i1 to i32
    %c0_i32_11 = arith.constant 0 : i32
    %21 = arith.cmpi ne, %20, %c0_i32_11 : i32
    scf.if %21 {
      %c0_12 = arith.constant 0 : index
      %c0_13 = arith.constant 0 : index
      %22 = vector.load %arg3[%c0_12, %c0_13] : memref<2x10xf32, #tpu.memory_space<vmem>>, vector<2x10xf32>
      %c0_14 = arith.constant 0 : index
      %c0_15 = arith.constant 0 : index
      %23 = vector.load %arg2[%c0_14, %c0_15] : memref<2x10xf32, #tpu.memory_space<vmem>>, vector<2x10xf32>
      %cst_16 = arith.constant 0.899999976 : f32
      %24 = vector.broadcast %cst_16 : f32 to vector<2x10xf32>
      %25 = arith.subf %24, %22 : vector<2x10xf32>
      %cst_17 = arith.constant 0.000000e+00 : f32
      %26 = vector.broadcast %cst_17 : f32 to vector<2x10xf32>
      %27 = arith.maximumf %25, %26 : vector<2x10xf32>
      %cst_18 = arith.constant 1.000000e-01 : f32
      %28 = vector.broadcast %cst_18 : f32 to vector<2x10xf32>
      %29 = arith.subf %22, %28 : vector<2x10xf32>
      %cst_19 = arith.constant 0.000000e+00 : f32
      %30 = vector.broadcast %cst_19 : f32 to vector<2x10xf32>
      %31 = arith.maximumf %29, %30 : vector<2x10xf32>
      %32 = arith.mulf %23, %27 : vector<2x10xf32>
      %33 = arith.mulf %32, %27 : vector<2x10xf32>
      %cst_20 = arith.constant 1.000000e+00 : f32
      %34 = vector.broadcast %cst_20 : f32 to vector<2x10xf32>
      %35 = arith.subf %34, %23 : vector<2x10xf32>
      %cst_21 = arith.constant 5.000000e-01 : f32
      %36 = vector.broadcast %cst_21 : f32 to vector<2x10xf32>
      %37 = arith.mulf %36, %35 : vector<2x10xf32>
      %38 = arith.mulf %37, %31 : vector<2x10xf32>
      %39 = arith.mulf %38, %31 : vector<2x10xf32>
      %40 = arith.addf %33, %39 : vector<2x10xf32>
      %41 = vector.shape_cast %40 : vector<2x10xf32> to vector<1x2x10xf32>
      %cst_22 = arith.constant dense<0.000000e+00> : vector<1xf32>
      %42 = vector.multi_reduction <add>, %41, %cst_22 [1, 2] : vector<1x2x10xf32> to vector<1xf32>
      %43 = vector.shape_cast %42 : vector<1xf32> to vector<1x1x1xf32>
      %44 = vector.extract %43[0, 0, 0] : f32 from vector<1x1x1xf32>
      %c0_23 = arith.constant 0 : index
      %c0_24 = arith.constant 0 : index
      %45 = vector.load %arg7[%c0_23, %c0_24] : memref<1x1xf32, #tpu.memory_space<vmem>>, vector<1x1xf32>
      %cst_25 = arith.constant 5.000000e-04 : f32
      %46 = vector.broadcast %cst_25 : f32 to vector<1x1xf32>
      %47 = arith.mulf %46, %45 : vector<1x1xf32>
      %48 = vector.broadcast %44 : f32 to vector<1x1xf32>
      %49 = arith.addf %48, %47 : vector<1x1xf32>
      %cst_26 = arith.constant 5.000000e-01 : f32
      %50 = vector.broadcast %cst_26 : f32 to vector<1x1xf32>
      %51 = arith.mulf %49, %50 : vector<1x1xf32>
      %c0_27 = arith.constant 0 : index
      %c0_28 = arith.constant 0 : index
      %52 = vector.load %arg6[%c0_27, %c0_28] : memref<1x1xf32, #tpu.memory_space<vmem>>, vector<1x1xf32>
      tpu.vector_store %arg6[%c0_27, %c0_28], %51 {strides = array<i32>} : memref<1x1xf32, #tpu.memory_space<vmem>>, vector<1x1xf32>,
    } else {
    }
    return
  }
  func.func @transform_0(%arg0: i32, %arg1: i32) -> (i32, i32) {
    %c0_i32 = arith.constant 0 : i32
    %c0_i32_0 = arith.constant 0 : i32
    %c0_i32_1 = arith.constant 0 : i32
    return %c0_i32, %c0_i32_0 : i32, i32
  }
  func.func @transform_1(%arg0: i32, %arg1: i32) -> (i32, i32) {
    %c0_i32 = arith.constant 0 : i32
    %c0_i32_0 = arith.constant 0 : i32
    %c0_i32_1 = arith.constant 0 : i32
    return %c0_i32, %c0_i32_0 : i32, i32
  }
  func.func @transform_2(%arg0: i32, %arg1: i32) -> (i32, i32) {
    %c0_i32 = arith.constant 0 : i32
    return %arg0, %arg1 : i32, i32
  }
  func.func @transform_3(%arg0: i32, %arg1: i32) -> (i32, i32) {
    %c0_i32 = arith.constant 0 : i32
    return %arg0, %arg1 : i32, i32
  }
  func.func @transform_4(%arg0: i32, %arg1: i32) -> (i32, i32) {
    %c0_i32 = arith.constant 0 : i32
    %c0_i32_0 = arith.constant 0 : i32
    %c0_i32_1 = arith.constant 0 : i32
    return %c0_i32, %c0_i32_0 : i32, i32
  }
}

</mosaic_0001>

<bundles_post_ra>
// kernel: tpu_custom_call.1
= control target key start
LH: loop header
LB: loop body
LE: loop exit
PB: predicated region body
PF: predicated region fallthrough
CT: control target
= control target key end

     0   :  { %9 = vsyncpa [#allocation4], 0  ;;  %s387_s0 = inlined_call_operand.hbm [shape: f32[2,10], index: 0, kind: input, shape index: {}]   ;;  %s388_s1 = inlined_call_operand.hbm [shape: f32[2,10], index: 1, kind: input, shape index: {}]   ;;  %s389_s2 = inlined_call_operand.hbm [shape: f32[2,1024], index: 2, kind: input, shape index: {}]   ;;  %s390_s3 = inlined_call_operand.hbm [shape: f32[2,1024], index: 3, kind: input, shape index: {}]   ;;  %s391_s4 = inlined_call_operand.hbm [shape: f32[1,1], index: 4, kind: output, shape index: {}]  }
   0x1   :  { %10 = vsyncpa [#allocation7], 0 }
   0x2   :  { %11 = vsyncpa [#allocation10], 0  ;;  %s29_s17 = sshll.u32 %s388_s1, 4  ;;  %s30_s17 = int_to_ptr.hbm [resolvable:$true] %s29_s17 }
   0x3   :  { %12 = vsyncpa [#allocation5], 0  ;;  %s330_s18 = smov [#allocation6]   ;;  %s18_s22 = sshll.u32 %s387_s0, 4  ;;  %s19_s22 = int_to_ptr.hbm [resolvable:$true] %s18_s22 }
   0x4   :  { %s31_s19 = sshll.u32 %s330_s18, 4  ;;  %s331_s23 = smov [#allocation3]   ;;  %s32_s19 = int_to_ptr.vmem [resolvable:$true] %s31_s19 }
   0x5   :  { %34 = dma.hbm_to_vmem [thread:$0]  %s30_s17, 32, %s32_s19, [#allocation7]  }
   0x6   :  { %s20_s24 = sshll.u32 %s331_s23, 4  ;;  %s40_s27 = sshll.u32 %s389_s2, 4  ;;  %s21_s24 = int_to_ptr.vmem [resolvable:$true] %s20_s24  ;;  %s41_s27 = int_to_ptr.hbm [resolvable:$true] %s40_s27 }
   0x7   :  { %23 = dma.hbm_to_vmem [thread:$0]  %s19_s22, 32, %s21_s24, [#allocation4]  }
   0x8   :  { %s51_s29 = sshll.u32 %s390_s3, 4  ;;  %s332_s30 = smov [#allocation8]   ;;  %s52_s29 = int_to_ptr.hbm [resolvable:$true] %s51_s29 }
   0x9   :  { %s42_s5 = sshll.u32 %s332_s30, 4  ;;  %s333_s0 = smov [#allocation9]   ;;  %s43_s5 = int_to_ptr.vmem [resolvable:$true] %s42_s5 }
   0xa   :  { %45 = dma.hbm_to_vmem [thread:$0]  %s41_s27, 256, %s43_s5, [#allocation7]  }
   0xb   :  { %s53_s6 = sshll.u32 %s333_s0, 4  ;;  %s54_s6 = int_to_ptr.vmem [resolvable:$true] %s53_s6 }
   0xc   :  { %56 = dma.hbm_to_vmem [thread:$0]  %s52_s29, 256, %s54_s6, [#allocation10]  }
   0xd   :  { %322 = dma.done.wait [#allocation4], 32  }
   0xe   :  { %323 = vsyncadd [#allocation4], 4294967264 }
   0xf   :  { %324 = dma.done.wait [#allocation7], 288  }
  0x10   :  { %325 = vsyncadd [#allocation7], 4294967008 }
  0x11   :  { %326 = dma.done.wait [#allocation10], 256  }
  0x12   :  { %327 = vsyncadd [#allocation10], 4294967040  ;;  %v81_v0 = vld [vmem:[#allocation9] sm:$0xff]  ;;  %v82_v1 = vld [vmem:[#allocation9 + $0x8] sm:$0xff]  ;;  %vm111_vm0 = vcmask 1041408   ;;  %vm155_vm1 = vcmask 74752  }
  0x13   :  { %v83_v2 = vld [vmem:[#allocation8] sm:$0xff]  ;;  %v84_v3 = vld [vmem:[#allocation8 + $0x8] sm:$0xff]  ;;  %v142_v8 = vld [vmem:[#allocation6] sm:$0x3]  ;;  %vm79_vm2 = vcmask 0   ;;  %v334_v45 = vmov 0.0  }
  0x14   :  { %v85_v4 = vsub.f32 %v81_v0, %v83_v2  ;;  %v86_v5 = vsub.f32 %v82_v1, %v84_v3  ;;  %v143_v10 = vld [vmem:[#allocation3] sm:$0x3]  ;;  %v144_v13 = vsub.f32 0.9, %v142_v8  ;;  %v191_v15 = vadd.f32 -0.1, %v142_v8 }
  0x15   :  { %v150_v19 = vsub.f32 1.0, %v143_v10  ;;  %80 = vst.msk [vmem:[#allocation2] sm:$0x1] %vm79_vm2, %v334_v45  ;;  %s335_s7 = smov [#allocation11]   ;;  %s179_s11 = sshll.u32 %s391_s4, 4  ;;  %s180_s11 = int_to_ptr.hbm [resolvable:$true] %s179_s11 }
  0x16   :  { %v88_v6 = vmul.f32 %v85_v4, %v85_v4  ;;  %v89_v7 = vmul.f32 %v86_v5, %v86_v5  ;;  %v145_v26 = vmax.f32 %v144_v13, 0.0  ;;  %v147_v27 = vmax.f32 %v191_v15, 0.0  ;;  %s177_s8 = sshll.u32 %s335_s7, 4  ;;  %s178_s8 = int_to_ptr.vmem [resolvable:$true] %s177_s8 }
  0x17   :  { %v151_v28 = vmul.f32 0.5, %v150_v19 }
  0x18   :  { %92 = vst [vmem:[#allocation1] ss:$4 sm:$0xff] %v88_v6  ;;  %v148_v35 = vmul.f32 %v145_v26, %v143_v10 }
  0x19   :  { %94 = vst [vmem:[#allocation1 + $0x20] ss:$4 sm:$0xff] %v89_v7  ;;  %v152_v36 = vmul.f32 %v151_v28, %v147_v27 }
  0x1a   :  { %v149_v40 = vmul.f32 %v148_v35, %v145_v26 }
  0x1b   :  { %v153_v41 = vmul.f32 %v152_v36, %v147_v27 }
  0x1c   :  { %v87_v60 = vld [vmem:[#allocation2] sm:$0x1] }
  0x1d   :  { %v154_v43 = vadd.f32 %v153_v41, %v149_v40 }
  0x1f   :  { %v95_v9 = vld.sshfl [vmem:[#allocation1] sm:$0xff pattern:$0x73625140]  ;;  %v96_v11 = vld.sshfl [vmem:[#allocation1 + $0x8] sm:$0xff pattern:$0x73625140] }
  0x20   :  { %v97_v12 = vld.sshfl [vmem:[#allocation1 + $0x10] sm:$0xff pattern:$0x73625140]  ;;  %v98_v14 = vld.sshfl [vmem:[#allocation1 + $0x18] sm:$0xff pattern:$0x73625140] }
  0x21   :  { %v112_v16 = vsel %vm111_vm0, %v95_v9, 0.0  ;;  %v113_v17 = vsel %vm111_vm0, %v96_v11, 0.0  ;;  %v115_v18 = vsel %vm111_vm0, %v97_v12, 0.0  ;;  %v99_v20 = vld.sshfl [vmem:[#allocation1 + $0x20] sm:$0xff pattern:$0x73625140] }
  0x22   :  { %v114_v21 = vadd.f32 %v113_v17, %v112_v16  ;;  %v117_v22 = vsel %vm111_vm0, %v98_v14, 0.0  ;;  %v100_v23 = vld.sshfl [vmem:[#allocation1 + $0x28] sm:$0xff pattern:$0x73625140]  ;;  %v119_v25 = vsel %vm111_vm0, %v99_v20, 0.0  ;;  %v156_v44 = vsel %vm155_vm1, %v154_v43, 0.0 }
  0x23   :  { %v101_v29 = vld.sshfl [vmem:[#allocation1 + $0x30] sm:$0xff pattern:$0x73625140]  ;;  %v121_v31 = vsel %vm111_vm0, %v100_v23, 0.0 }
  0x24   :  { %v116_v24 = vadd.f32 %v115_v18, %v114_v21  ;;  %v102_v32 = vld.sshfl [vmem:[#allocation1 + $0x38] sm:$0xff pattern:$0x73625140]  ;;  %v123_v34 = vsel %vm111_vm0, %v101_v29, 0.0 }
  0x25   :  { %v125_v38 = vsel %vm111_vm0, %v102_v32, 0.0 }
  0x26   :  { %v118_v30 = vadd.f32 %v117_v22, %v116_v24 }
  0x28   :  { %v120_v33 = vadd.f32 %v119_v25, %v118_v30 }
  0x2a   :  { %v122_v37 = vadd.f32 %v121_v31, %v120_v33 }
  0x2c   :  { %v124_v39 = vadd.f32 %v123_v34, %v122_v37 }
  0x2e   :  { %v126_v42 = vadd.f32 %v125_v38, %v124_v39 }
  0x30   :  { %127 = vadd.xlane.f32.xlu0 %v126_v42 }
  0x38   :  { %157 = vadd.xlane.f32.xlu0 %v156_v44 }
  0xa3   :  { %v128_v46 = vpop.xlane.xlu0 %127 }
  0xa4   :  { %v129_v47 = vrot.slane %v128_v46, 4 }
  0xa6   :  { %v130_v48 = vadd.f32 %v129_v47, %v128_v46 }
  0xa8   :  { %v131_v49 = vrot.slane %v130_v48, 2 }
  0xaa   :  { %v132_v50 = vadd.f32 %v131_v49, %v130_v48 }
  0xab   :  { %v158_v51 = vpop.xlane.xlu0 %157 }
  0xac   :  { %v159_v52 = vrot.slane %v158_v51, 4  ;;  %v133_v53 = vrot.slane %v132_v50, 1 }
  0xae   :  { %v160_v54 = vadd.f32 %v159_v52, %v158_v51  ;;  %v134_v55 = vadd.f32 %v133_v53, %v132_v50 }
  0xb0   :  { %v161_v56 = vrot.slane %v160_v54, 2  ;;  %192 = vpush %v134_v55 }
  0xb2   :  { %v162_v57 = vadd.f32 %v161_v56, %v160_v54 }
  0xb4   :  { %v163_v58 = vrot.slane %v162_v57, 1 }
  0xb6   :  { %v164_v59 = vadd.f32 %v163_v58, %v162_v57 }
  0xb8   :  { %194 = vpush %v164_v59 }
  0xe1   :  { %s193_s2 = spop %192 }
  0xe2   :  { %v136_v61 = vstv %s193_s2 }
  0xe3   :  { %v137_v62 = vadd.f32 %v136_v61, %v87_v60 }
  0xe5   :  { %139 = vst.msk [vmem:[#allocation2] sm:$0x1] %vm79_vm2, %v137_v62 }
  0xe9   :  { %s195_s3 = spop %194 }
  0xea   :  { %v168_v1 = vstv %s195_s3 }
  0xec   :  { %v166_v63 = vld [vmem:[#allocation2] sm:$0x1] }
  0xed   :  { %v167_v0 = vmul.f32 0.0005, %v166_v63 }
  0xef   :  { %v169_v2 = vadd.f32 %v168_v1, %v167_v0 }
  0xf1   :  { %v170_v3 = vmul.f32 0.5, %v169_v2 }
  0xf3   :  { %171 = vst.msk [vmem:[#allocation11] sm:$0x1] %vm79_vm2, %v170_v3 }
  0xf4   :  { %182 = dma.vmem_to_hbm [thread:$0]  %s178_s8, 16, %s180_s11, [#allocation5]  }
  0xf5   :  { %328 = dma.done.wait [#allocation5], 16  }
  0xf6   :  { %329 = vsyncadd [#allocation5], 4294967280 }
  0xf7   :  { %187 = vsyncpa [#allocation4], 1 }
  0xf8   :  { %188 = vsyncpa [#allocation7], 1 }
  0xf9   :  { %189 = vsyncpa [#allocation10], 1 }
  0xfa   :  { %190 = vsyncpa [#allocation5], 1 }

</bundles_post_ra>
